<compile_context>
chip_gen: v7x
topology: tpu7x:2x2x1
jax: 0.10.0
libtpu: 0.0.40
codegen_flags: <defaults>
</compile_context>

<pallas_src>
import jax
import jax.numpy as jnp
from jax.experimental import pallas as pl
from jax.experimental.pallas import tpu as pltpu

_SQRT_2_OVER_PI = 0.7978845608028654  # sqrt(2/pi)


def ffn_kernel(x_ref, w1_ref, b1_ref, w2_ref, b2_ref, o_ref, acc_ref):
    """One (token-tile, hidden-tile) step of fc2(GELU(fc1(x)))."""
    h_idx = pl.program_id(1)

    @pl.when(h_idx == 0)
    def _():
        acc_ref[...] = jnp.zeros_like(acc_ref)

    # fc1 partial slab: (tm, th).  Native-dtype operands, f32 accumulation.
    h = jnp.dot(x_ref[...], w1_ref[...], preferred_element_type=jnp.float32)
    h = h + b1_ref[...]

    # Custom GELU from the reference module (0.8 coefficient, not 0.5).
    # tanh goes to the EUP slot; polynomial kept to a single h*h reuse.
    h2 = h * h
    inner = _SQRT_2_OVER_PI * h * (1.0 + 0.044715 * h2)
    g = 0.8 * h * (1.0 + jnp.tanh(inner))

    # fc2 partial product accumulated over hidden tiles into f32 scratch.
    acc_ref[...] += jnp.dot(
        g.astype(w2_ref.dtype), w2_ref[...], preferred_element_type=jnp.float32
    )

    @pl.when(h_idx == pl.num_programs(1) - 1)
    def _():
        # fc2 bias added exactly once, at the final reduction step.
        o_ref[...] = (acc_ref[...] + b2_ref[...]).astype(o_ref.dtype)


def _pick_hidden_tile(H, preferred=512):
    if H <= preferred:
        return H
    for cand in (preferred, 256, 128):
        if H % cand == 0:
            return cand
    return H


def feed_forward(x, w1_t, b1, w2_t, b2, *, tm=None, th=None):
    """Fused FFN: fc2(GELU(fc1(x))).

    x:    (B, S, E)
    w1_t: (E, H)   fc1 weight pre-transposed to (in, out), H = 4*E
    b1:   (H,)
    w2_t: (H, E)   fc2 weight pre-transposed to (in, out)
    b2:   (E,)
    """
    B, S, E = x.shape
    H = w1_t.shape[1]
    M = B * S
    x2d = x.reshape(M, E)

    # Token tile: single block for small M, otherwise 256 rows (multiple of 8).
    if tm is None:
        tm = M if M <= 256 else 256
    # Hidden tile: keep VMEM usage independent of H.
    if th is None:
        th = _pick_hidden_tile(H)
    assert H % th == 0, "hidden tile must divide H"

    nm = pl.cdiv(M, tm)
    Mp = nm * tm
    if Mp != M:
        x2d = jnp.pad(x2d, ((0, Mp - M), (0, 0)))
    nh = H // th

    b1_2d = b1.reshape(1, H)
    b2_2d = b2.reshape(1, E)

    itemsize = jnp.dtype(x.dtype).itemsize
    cost = pl.CostEstimate(
        flops=4 * Mp * E * H,                    # 2*M*E*H (fc1) + 2*M*H*E (fc2)
        transcendentals=Mp * H,                  # tanh per hidden element
        bytes_accessed=(2 * Mp * E + 2 * E * H + H + E) * itemsize,
    )

    out2d = pl.pallas_call(
        ffn_kernel,
        out_shape=jax.ShapeDtypeStruct((Mp, E), x.dtype),
        grid_spec=pltpu.PrefetchScalarGridSpec(
            num_scalar_prefetch=0,
            grid=(nm, nh),
            in_specs=[
                pl.BlockSpec((tm, E), lambda i, h: (i, 0)),   # x tile (held across h)
                pl.BlockSpec((E, th), lambda i, h: (0, h)),   # w1 hidden slice
                pl.BlockSpec((1, th), lambda i, h: (0, h)),   # b1 hidden slice
                pl.BlockSpec((th, E), lambda i, h: (h, 0)),   # w2 hidden slice
                pl.BlockSpec((1, E), lambda i, h: (0, 0)),    # b2 (constant block)
            ],
            out_specs=pl.BlockSpec((tm, E), lambda i, h: (i, 0)),
            scratch_shapes=[pltpu.VMEM((tm, E), jnp.float32)],
        ),
        compiler_params=pltpu.CompilerParams(
            dimension_semantics=("parallel", "arbitrary"),
            vmem_limit_bytes=48 * 1024 * 1024,
        ),
        cost_estimate=cost,
    )(x2d, w1_t, b1_2d, w2_t, b2_2d)

    if Mp != M:
        out2d = out2d[:M]
    return out2d.reshape(B, S, E)


def reference_feed_forward(x, w1, b1, w2, b2):
    """Pure-JAX reference with PyTorch-layout weights: w1 (H,E), w2 (E,H)."""
    h = jnp.einsum("bse,he->bsh", x, w1) + b1
    c = jnp.sqrt(2.0 / jnp.pi)
    g = 0.8 * h * (1.0 + jnp.tanh(c * (h + 0.044715 * h ** 3)))
    return jnp.einsum("bsh,eh->bse", g, w2) + b2


if __name__ == "__main__":
    key = jax.random.PRNGKey(0)

    # --- toy config matching the module: cfg = {'emb_dim': 32}, hidden = 128 ---
    B, S, E = 2, 8, 32
    H = 4 * E
    kx, kw1, kb1, kw2, kb2, kx2, kw12, kb12, kw22, kb22 = jax.random.split(key, 10)

    x = jax.random.normal(kx, (B, S, E), dtype=jnp.float32)
    # PyTorch Linear layouts: weight (out, in), bias (out,)
    w1 = jax.random.normal(kw1, (H, E), dtype=jnp.float32) * 0.05
    b1 = jax.random.normal(kb1, (H,), dtype=jnp.float32) * 0.05
    w2 = jax.random.normal(kw2, (E, H), dtype=jnp.float32) * 0.05
    b2 = jax.random.normal(kb2, (E,), dtype=jnp.float32) * 0.05

    # Transpose once at parameter-build time (not per call).
    w1_t, w2_t = w1.T, w2.T

    out = jax.block_until_ready(feed_forward(x, w1_t, b1, w2_t, b2))
    ref = reference_feed_forward(x, w1, b1, w2, b2)
    assert out.shape == (B, S, E)
    assert jnp.allclose(out, ref, atol=1e-4, rtol=1e-4), "mismatch vs reference (toy)"

    # --- larger check exercising multi-token-tile + multi-hidden-tile path ---
    B2, S2, E2 = 2, 256, 128
    H2 = 4 * E2
    x_l = jax.random.normal(kx2, (B2, S2, E2), dtype=jnp.float32)
    w1_l = jax.random.normal(kw12, (H2, E2), dtype=jnp.float32) * 0.02
    b1_l = jax.random.normal(kb12, (H2,), dtype=jnp.float32) * 0.02
    w2_l = jax.random.normal(kw22, (E2, H2), dtype=jnp.float32) * 0.02
    b2_l = jax.random.normal(kb22, (E2,), dtype=jnp.float32) * 0.02

    out_l = jax.block_until_ready(
        feed_forward(x_l, w1_l.T, b1_l, w2_l.T, b2_l, th=128)
    )
    ref_l = reference_feed_forward(x_l, w1_l, b1_l, w2_l, b2_l)
    assert out_l.shape == (B2, S2, E2)
    assert jnp.allclose(out_l, ref_l, atol=1e-3, rtol=1e-3), "mismatch vs reference (large)"

    print("KERNEL_OK")
</pallas_src>

<mosaic_0001>
module attributes {stable_mosaic.version = 11 : i64} {
  func.func @ffn_kernel(%arg0: i32, %arg1: i32, %arg2: memref<16x32xf32, #tpu.memory_space<vmem>>, %arg3: memref<32x128xf32, #tpu.memory_space<vmem>>, %arg4: memref<1x128xf32, #tpu.memory_space<vmem>>, %arg5: memref<128x32xf32, #tpu.memory_space<vmem>>, %arg6: memref<1x32xf32, #tpu.memory_space<vmem>>, %arg7: memref<16x32xf32, #tpu.memory_space<vmem>>, %arg8: memref<16x32xf32, #tpu.memory_space<vmem>>) attributes {dimension_semantics = [#tpu.dimension_semantics<parallel>, #tpu.dimension_semantics<arbitrary>], iteration_bounds = array<i64: 1, 1>, scalar_prefetch = 0 : i64, scratch_operands = 1 : i64, tpu.core_type = #tpu.core_type<tc>, window_params = [{transform_indices = @transform_0, window_bounds = array<i64: 16, 32>}, {transform_indices = @transform_1, window_bounds = array<i64: 32, 128>}, {transform_indices = @transform_2, window_bounds = array<i64: 1, 128>}, {transform_indices = @transform_3, window_bounds = array<i64: 128, 32>}, {pipeline_mode = #tpu.pipeline_mode<synchronous>, transform_indices = @transform_4, window_bounds = array<i64: 1, 32>}, {transform_indices = @transform_5, window_bounds = array<i64: 16, 32>}]} {
    %c0_i32 = arith.constant 0 : i32
    %0 = arith.cmpi eq, %arg1, %c0_i32 : i32
    %1 = arith.extui %0 : i1 to i32
    %c0_i32_0 = arith.constant 0 : i32
    %2 = arith.cmpi ne, %1, %c0_i32_0 : i32
    scf.if %2 {
      %cst_20 = arith.constant 0.000000e+00 : f32
      %31 = vector.broadcast %cst_20 : f32 to vector<16x32xf32>
      %c0_21 = arith.constant 0 : index
      %c0_22 = arith.constant 0 : index
      %32 = vector.load %arg8[%c0_21, %c0_22] : memref<16x32xf32, #tpu.memory_space<vmem>>, vector<16x32xf32>
      tpu.vector_store %arg8[%c0_21, %c0_22], %31 {strides = array<i32>} : memref<16x32xf32, #tpu.memory_space<vmem>>, vector<16x32xf32>,
    } else {
    }
    %c0 = arith.constant 0 : index
    %c0_1 = arith.constant 0 : index
    %3 = vector.load %arg2[%c0, %c0_1] : memref<16x32xf32, #tpu.memory_space<vmem>>, vector<16x32xf32>
    %c0_2 = arith.constant 0 : index
    %c0_3 = arith.constant 0 : index
    %4 = vector.load %arg3[%c0_2, %c0_3] : memref<32x128xf32, #tpu.memory_space<vmem>>, vector<32x128xf32>
    %cst = arith.constant dense<0.000000e+00> : vector<16x128xf32>
    %5 = tpu.matmul %3, %4, %cst {dimension_numbers = #tpu.dot_dimension_numbers<[1], [0], [0], [1], [0, 0, 1, 1], [], []>} : vector<16x32xf32>, vector<32x128xf32>, vector<16x128xf32> -> vector<16x128xf32>
    %c0_4 = arith.constant 0 : index
    %c0_5 = arith.constant 0 : index
    %6 = vector.load %arg4[%c0_4, %c0_5] : memref<1x128xf32, #tpu.memory_space<vmem>>, vector<1x128xf32>
    %7 = vector.broadcast %6 : vector<1x128xf32> to vector<16x128xf32>
    %8 = arith.addf %5, %7 : vector<16x128xf32>
    %9 = arith.mulf %8, %8 : vector<16x128xf32>
    %cst_6 = arith.constant 0.797884583 : f32
    %10 = vector.broadcast %cst_6 : f32 to vector<16x128xf32>
    %11 = arith.mulf %10, %8 : vector<16x128xf32>
    %cst_7 = arith.constant 4.471500e-02 : f32
    %12 = vector.broadcast %cst_7 : f32 to vector<16x128xf32>
    %13 = arith.mulf %12, %9 : vector<16x128xf32>
    %cst_8 = arith.constant 1.000000e+00 : f32
    %14 = vector.broadcast %cst_8 : f32 to vector<16x128xf32>
    %15 = arith.addf %14, %13 : vector<16x128xf32>
    %16 = arith.mulf %11, %15 : vector<16x128xf32>
    %cst_9 = arith.constant 8.000000e-01 : f32
    %17 = vector.broadcast %cst_9 : f32 to vector<16x128xf32>
    %18 = arith.mulf %17, %8 : vector<16x128xf32>
    %19 = math.tanh %16 : vector<16x128xf32>
    %cst_10 = arith.constant 1.000000e+00 : f32
    %20 = vector.broadcast %cst_10 : f32 to vector<16x128xf32>
    %21 = arith.addf %20, %19 : vector<16x128xf32>
    %22 = arith.mulf %18, %21 : vector<16x128xf32>
    %c0_11 = arith.constant 0 : index
    %c0_12 = arith.constant 0 : index
    %23 = vector.load %arg8[%c0_11, %c0_12] : memref<16x32xf32, #tpu.memory_space<vmem>>, vector<16x32xf32>
    %c0_13 = arith.constant 0 : index
    %c0_14 = arith.constant 0 : index
    %24 = vector.load %arg5[%c0_13, %c0_14] : memref<128x32xf32, #tpu.memory_space<vmem>>, vector<128x32xf32>
    %cst_15 = arith.constant dense<0.000000e+00> : vector<16x32xf32>
    %25 = tpu.matmul %22, %24, %cst_15 {dimension_numbers = #tpu.dot_dimension_numbers<[1], [0], [0], [1], [0, 0, 1, 1], [], []>} : vector<16x128xf32>, vector<128x32xf32>, vector<16x32xf32> -> vector<16x32xf32>
    %26 = arith.addf %23, %25 : vector<16x32xf32>
    %c0_16 = arith.constant 0 : index
    %c0_17 = arith.constant 0 : index
    %27 = vector.load %arg8[%c0_16, %c0_17] : memref<16x32xf32, #tpu.memory_space<vmem>>, vector<16x32xf32>
    tpu.vector_store %arg8[%c0_16, %c0_17], %26 {strides = array<i32>} : memref<16x32xf32, #tpu.memory_space<vmem>>, vector<16x32xf32>,
    %c0_i32_18 = arith.constant 0 : i32
    %28 = arith.cmpi eq, %arg1, %c0_i32_18 : i32
    %29 = arith.extui %28 : i1 to i32
    %c0_i32_19 = arith.constant 0 : i32
    %30 = arith.cmpi ne, %29, %c0_i32_19 : i32
    scf.if %30 {
      %c0_20 = arith.constant 0 : index
      %c0_21 = arith.constant 0 : index
      %31 = vector.load %arg8[%c0_20, %c0_21] : memref<16x32xf32, #tpu.memory_space<vmem>>, vector<16x32xf32>
      %c0_22 = arith.constant 0 : index
      %c0_23 = arith.constant 0 : index
      %32 = vector.load %arg6[%c0_22, %c0_23] : memref<1x32xf32, #tpu.memory_space<vmem>>, vector<1x32xf32>
      %33 = vector.broadcast %32 : vector<1x32xf32> to vector<16x32xf32>
      %34 = arith.addf %31, %33 : vector<16x32xf32>
      %c0_24 = arith.constant 0 : index
      %c0_25 = arith.constant 0 : index
      %35 = vector.load %arg7[%c0_24, %c0_25] : memref<16x32xf32, #tpu.memory_space<vmem>>, vector<16x32xf32>
      tpu.vector_store %arg7[%c0_24, %c0_25], %34 {strides = array<i32>} : memref<16x32xf32, #tpu.memory_space<vmem>>, vector<16x32xf32>,
    } else {
    }
    return
  }
  func.func @transform_0(%arg0: i32, %arg1: i32) -> (i32, i32) {
    %c0_i32 = arith.constant 0 : i32
    %c0_i32_0 = arith.constant 0 : i32
    return %arg0, %c0_i32 : i32, i32
  }
  func.func @transform_1(%arg0: i32, %arg1: i32) -> (i32, i32) {
    %c0_i32 = arith.constant 0 : i32
    %c0_i32_0 = arith.constant 0 : i32
    return %c0_i32, %arg1 : i32, i32
  }
  func.func @transform_2(%arg0: i32, %arg1: i32) -> (i32, i32) {
    %c0_i32 = arith.constant 0 : i32
    %c0_i32_0 = arith.constant 0 : i32
    return %c0_i32, %arg1 : i32, i32
  }
  func.func @transform_3(%arg0: i32, %arg1: i32) -> (i32, i32) {
    %c0_i32 = arith.constant 0 : i32
    %c0_i32_0 = arith.constant 0 : i32
    return %arg1, %c0_i32 : i32, i32
  }
  func.func @transform_4(%arg0: i32, %arg1: i32) -> (i32, i32) {
    %c0_i32 = arith.constant 0 : i32
    %c0_i32_0 = arith.constant 0 : i32
    %c0_i32_1 = arith.constant 0 : i32
    return %c0_i32, %c0_i32_0 : i32, i32
  }
  func.func @transform_5(%arg0: i32, %arg1: i32) -> (i32, i32) {
    %c0_i32 = arith.constant 0 : i32
    %c0_i32_0 = arith.constant 0 : i32
    return %arg0, %c0_i32 : i32, i32
  }
}

</mosaic_0001>

<bundles_post_ra>
// kernel: tpu_custom_call.1
= control target key start
LH: loop header
LB: loop body
LE: loop exit
PB: predicated region body
PF: predicated region fallthrough
CT: control target
= control target key end

     0   :  { %vm25_vm0 = vcmask 261120   ;;  %s542_s0 = inlined_call_operand.vmem [shape: f32[16,32], index: 0, kind: input, shape index: {}]   ;;  %s543_s1 = inlined_call_operand.vmem [shape: f32[32,128], index: 1, kind: input, shape index: {}]   ;;  %s544_s2 = inlined_call_operand.vmem [shape: f32[1,128], index: 2, kind: input, shape index: {}]   ;;  %s545_s3 = inlined_call_operand.vmem [shape: f32[128,32], index: 3, kind: input, shape index: {}]   ;;  %s546_s4 = inlined_call_operand.vmem [shape: f32[1,32], index: 4, kind: input, shape index: {}]   ;;  %s547_s5 = inlined_call_operand.hbm [shape: f32[16,32], index: 5, kind: output, shape index: {}]  }
   0x1   :  { %v30_v0 = vld [vmem:[%s543_s1] sm:$0xff]  ;;  %v31_v1 = vld [vmem:[%s543_s1 + $0x8] sm:$0xff]  ;;  %v32_v2 = vld [vmem:[%s543_s1 + $0x10] sm:$0xff] }
   0x2   :  { %v344_v3 = vpack.c.bf16 %v31_v1, %v30_v0  ;;  %v33_v4 = vld [vmem:[%s543_s1 + $0x18] sm:$0xff]  ;;  %v28_v5 = vld [vmem:[%s542_s0] sm:$0xff]  ;;  %v144_v8 = vld [vmem:[%s545_s3 + $0x8] sm:$0xff] }
   0x3   :  { %v348_v6 = vpack.c.bf16 %v33_v4, %v32_v2  ;;  %306 = vmatprep.mubr.msk.f32.mxu0 %vm25_vm0, %v28_v5  ;;  %v143_v7 = vld [vmem:[%s545_s3] sm:$0xff] }
   0x4   :  { %10 = vsyncpa [#allocation4], 0  ;;  %345 = vmatprep.subr.bf16.mxu0 %v344_v3  ;;  %v352_v9 = vpack.c.bf16 %v144_v8, %v143_v7  ;;  %v29_v10 = vld [vmem:[%s542_s0 + $0x8] sm:$0xff]  ;;  %v145_v11 = vld [vmem:[%s545_s3 + $0x10] sm:$0xff]  ;;  %v416_v32 = vmov 0.0   ;;  %s417_s11 = smov [#allocation3]  }
   0x5   :  { %347 = vmatpush3.bf16.msra.mxu0 %v344_v3  ;;  %v146_v12 = vld [vmem:[%s545_s3 + $0x18] sm:$0xff]  ;;  %v147_v14 = vld [vmem:[%s545_s3 + $0x20] sm:$0xff]  ;;  %v148_v15 = vld [vmem:[%s545_s3 + $0x28] sm:$0xff]  ;;  %27 = vst.msk [vmem:[#allocation2 + $0x8] sm:$0xff] %vm25_vm0, %v416_v32  ;;  %s259_s12 = sshll.u32 %s417_s11, 4  ;;  %s260_s12 = int_to_ptr.vmem [resolvable:$true] %s259_s12 }
   0x6   :  { %349 = vmatprep.subr.bf16.mxu0 %v348_v6  ;;  %353 = vmatprep.subr.bf16.mxu1 %v352_v9  ;;  %v356_v13 = vpack.c.bf16 %v146_v12, %v145_v11  ;;  %v360_v16 = vpack.c.bf16 %v148_v15, %v147_v14  ;;  %v149_v17 = vld [vmem:[%s545_s3 + $0x30] sm:$0xff]  ;;  %v150_v18 = vld [vmem:[%s545_s3 + $0x38] sm:$0xff]  ;;  %v151_v20 = vld [vmem:[%s545_s3 + $0x40] sm:$0xff]  ;;  %26 = vst.msk [vmem:[#allocation2] sm:$0xff] %vm25_vm0, %v416_v32  ;;  %s392_s13 = scalar_lea.vmem %s260_s12, 256  ;;  %p397_p1 = scmp.lt.s32.totalorder %s260_s12, %s260_s12 }
   0x7   :  { %355 = vmatpush3.bf16.msra.mxu1 %v352_v9  ;;  %v364_v19 = vpack.c.bf16 %v150_v18, %v149_v17  ;;  %v152_v21 = vld [vmem:[%s545_s3 + $0x48] sm:$0xff]  ;;  %v153_v23 = vld [vmem:[%s545_s3 + $0x50] sm:$0xff]  ;;  %v154_v24 = vld [vmem:[%s545_s3 + $0x58] sm:$0xff]  ;;  %p393_p0 = scmp.ne.s32.totalorder %s260_s12, %s392_s13  ;;  %p398_p2 = scmp.lt.s32.totalorder %s392_s13, %s392_s13 }
   0x8   :  { %357 = vmatprep.subr.bf16.mxu1 %v356_v13  ;;  %v368_v22 = vpack.c.bf16 %v152_v21, %v151_v20  ;;  %v155_v25 = vld [vmem:[%s545_s3 + $0x60] sm:$0xff]  ;;  %v372_v26 = vpack.c.bf16 %v154_v24, %v153_v23  ;;  %v156_v27 = vld [vmem:[%s545_s3 + $0x68] sm:$0xff]  ;;  %v157_v29 = vld [vmem:[%s545_s3 + $0x70] sm:$0xff] }
   0x9   :  { %351 = vmatpush3.bf16.msra.mxu0 %v348_v6  ;;  %v376_v28 = vpack.c.bf16 %v156_v27, %v155_v25  ;;  %v158_v30 = vld [vmem:[%s545_s3 + $0x78] sm:$0xff]  ;;  %v270_v33 = vld [vmem:[%s544_s2] ss:$0 sm:$0xff]  ;;  %p399_p3 = por %p398_p2, %p397_p1 }
   0xa   :  { %v380_v31 = vpack.c.bf16 %v158_v30, %v157_v29  ;;  %v273_v62 = vld [vmem:[%s546_s4] ss:$0 sm:$0xff] }
   0xb   :  { %359 = vmatpush3.bf16.msra.mxu1 %v356_v13  ;;  %p400_p4 = pnand %p399_p3, %p393_p0 }
   0xc   :  { %307 = vmatmul.mubr.msk.f32.vlgmr.msra.gmra.mrb[0].mxu0 %vm25_vm0, %v29_v10  ;;  %361 = vmatprep.subr.bf16.mxu1 %v360_v16  ;;  %v142_v56 = vld [vmem:[#allocation2 + $0x8] sm:$0xff] }
   0xd   :  { %v141_v57 = vld [vmem:[#allocation2] sm:$0xff] }
   0xf   :  { %363 = vmatpush3.bf16.msra.mxu1 %v360_v16 }
  0x10   :  { %365 = vmatprep.subr.bf16.mxu1 %v364_v19 }
  0x13   :  { %367 = vmatpush3.bf16.msra.mxu1 %v364_v19 }
  0x14   :  { %369 = vmatprep.subr.bf16.mxu1 %v368_v22 }
  0x17   :  { %371 = vmatpush3.bf16.msra.mxu1 %v368_v22 }
  0x18   :  { %373 = vmatprep.subr.bf16.mxu1 %v372_v26 }
  0x1b   :  { %375 = vmatpush3.bf16.msra.mxu1 %v372_v26 }
  0x1c   :  { %377 = vmatprep.subr.bf16.mxu1 %v376_v28 }
  0x1f   :  { %379 = vmatpush3.bf16.msra.mxu1 %v376_v28 }
  0x20   :  { %381 = vmatprep.subr.bf16.mxu1 %v380_v31 }
  0x23   :  { %383 = vmatpush3.bf16.msra.mxu1 %v380_v31 }
  0xdf   :  { %v308_v34 = vpop.f32.mrb[0].mxu0 }
  0xe0   :  { %v120_v35 = vadd.f32 %v308_v34, %v270_v33  ;;  %v114_v36 = vpop.f32.mrb[1].mxu0 }
  0xe1   :  { %v115_v37 = vadd.f32 %v270_v33, %v114_v36 }
  0xe2   :  { %v124_v38 = vmul.f32 %v120_v35, %v120_v35  ;;  %v126_v42 = vmul.f32 0.7978846, %v120_v35  ;;  %v134_v53 = vmul.f32 0.8, %v120_v35 }
  0xe3   :  { %v123_v39 = vmul.f32 %v115_v37, %v115_v37  ;;  %v125_v44 = vmul.f32 0.7978846, %v115_v37  ;;  %v133_v51 = vmul.f32 0.8, %v115_v37 }
  0xe4   :  { %v128_v40 = vmul.f32 0.044715, %v124_v38 }
  0xe5   :  { %v127_v41 = vmul.f32 0.044715, %v123_v39 }
  0xe6   :  { %v130_v43 = vadd.f32 1.0, %v128_v40 }
  0xe7   :  { %v129_v45 = vadd.f32 1.0, %v127_v41 }
  0xe8   :  { %v132_v46 = vmul.f32 %v130_v43, %v126_v42 }
  0xe9   :  { %v131_v47 = vmul.f32 %v129_v45, %v125_v44 }
  0xea   :  { %388 = vtanh.f32 %v132_v46 }
  0xeb   :  { %390 = vtanh.f32 %v131_v47 }
  0xf4   :  { %v389_v48 = vpop.eup %388 }
  0xf5   :  { %v391_v49 = vpop.eup %390  ;;  %v138_v50 = vadd.f32 1.0, %v389_v48 }
  0xf6   :  { %v137_v52 = vadd.f32 1.0, %v391_v49 }
  0xf7   :  { %v140_v55 = vmul.f32 %v138_v50, %v134_v53 }
  0xf8   :  { %v139_v54 = vmul.f32 %v137_v52, %v133_v51 }
  0xfa   :  { %341 = vmatprep.mubr.f32.mxu1 %v139_v54 }
  0xfb   :  { %342 = vmatmul.mubr.f32.vlgmr.msra.gmra.mrb[0].mxu1 %v140_v55 }
 0x1ce   :  { %v343_v58 = vpop.f32.mrb[0].mxu1 }
 0x1cf   :  { %v235_v59 = vadd.f32 %v343_v58, %v142_v56  ;;  %v225_v60 = vpop.f32.mrb[1].mxu1 }
 0x1d0   :  { %v234_v61 = vadd.f32 %v225_v60, %v141_v57 }
 0x1d1   :  { %237 = vst.msk [vmem:[#allocation2 + $0x8] sm:$0xff] %vm25_vm0, %v235_v59 }
 0x1d2   :  { %236 = vst.msk [vmem:[#allocation2] sm:$0xff] %vm25_vm0, %v234_v61 }
 0x1d8   :  { %v242_v63 = vld [vmem:[#allocation2 + $0x8] sm:$0xff] }
 0x1d9   :  { %v241_v0 = vld [vmem:[#allocation2] sm:$0xff]  ;;  %v251_v1 = vadd.f32 %v273_v62, %v242_v63 }
 0x1da   :  { %v250_v2 = vadd.f32 %v273_v62, %v241_v0 }
 0x1db   :  { %253 = vst.msk [vmem:[#allocation3 + $0x8] sm:$0xff] %vm25_vm0, %v251_v1 }
 0x1dc   :  { %252 = vst.msk [vmem:[#allocation3] sm:$0xff] %vm25_vm0, %v250_v2 }
 0x1dd   :  { %403 = shalt.err (!%p400_p4)
}
 0x1de   :  { %s404_s15 = scalar_lea.hbm %s547_s5, 256 }
 0x1df   :  { %p405_p5 = scmp.ne.s32.totalorder %s547_s5, %s404_s15  ;;  %p408_p6 = scmp.lt.u32.totalorder %s404_s15, %s547_s5 }
 0x1e1   :  { %p410_p7 = pnand %p408_p6, %p405_p5 }
 0x1e3   :  { %413 = shalt.err (!%p410_p7)
}
 0x1e4   :  { %s418_s19 = smov 128   ;;  %s419_s20 = smov 8  }
 0x1e5   :  { %265 = dma.vmem_to_hbm [thread:$0]  %s260_s12, 256, %s547_s5, [#allocation4], %s418_s19, %s418_s19, %s419_s20  }
 0x1e6   :  { %414 = dma.done.wait [#allocation4], 256  }
 0x1e7   :  { %415 = vsyncadd [#allocation4], 4294967040 }
 0x1e8   :  { %269 = vsyncpa [#allocation4], 1 }

</bundles_post_ra>
